<compile_context>
chip_gen: v7x
topology: tpu7x:2x2x1
jax: 0.10.0
libtpu: 0.0.40
codegen_flags: <defaults>
</compile_context>

<pallas_src>
import jax
import jax.numpy as jnp
from jax import lax
from jax.experimental import pallas as pl
from jax.experimental.pallas import tpu as pltpu

HIDDEN = 32
INPUT_SIZE = 1

# Above this sequence length, fall back from the fully-unrolled static Python
# loop to lax.fori_loop with a modest unroll (bounds code size / vreg pressure).
_FULL_UNROLL_MAX_SEQ = 128


def rnn_kernel(x_ref, h0_ref, w_hh_ref, params_ref, pred_ref, hn_ref):
    """Single-program kernel; the whole recurrence runs on-chip.

    x_ref:      (S, B) f32 VMEM   (input, trailing singleton dim squeezed)
    h0_ref:     (H, B) f32 VMEM   (initial hidden state, feature-major)
    w_hh_ref:   (H, H) f32 VMEM   (nn.RNN weight_hh_l0, used untransposed)
    params_ref: (H, 4) f32 VMEM   (col 0: w_ih, col 1: b_ih+b_hh,
                                   col 2: w_out, col 3: b_out replicated)
    pred_ref:   (S, B) f32 VMEM output (wrapper adds the trailing singleton dim)
    hn_ref:     (H, B) f32 VMEM output (wrapper transposes back to (1, B, H))
    """
    seq_len, batch = x_ref.shape
    hidden = w_hh_ref.shape[0]

    # Hoist all loop-invariant loads / broadcasts (JAX does not CSE
    # broadcast_in_dim, so doing these inside the loop would repeat them).
    w_hh = w_hh_ref[...]                                             # (H, H)
    w_ih_b = jnp.broadcast_to(params_ref[:, 0:1], (hidden, batch))   # (H, B)
    bias_b = jnp.broadcast_to(params_ref[:, 1:2], (hidden, batch))   # (H, B)
    w_out_b = jnp.broadcast_to(params_ref[:, 2:3], (hidden, batch))  # (H, B)
    b_out_b = jnp.broadcast_to(params_ref[0:1, 3:4], (1, batch))     # (1, B)

    # TODO(synk): if the bundle dump shows Mosaic re-pushing W_hh into the MXU
    # weight registers every step, switch to explicit pltpu.matmul_push_rhs /
    # matmul_acc_lhs / matmul_pop to keep it resident across the recurrence.
    def step(t, h_prev):
        x_row = x_ref[pl.ds(t, 1), :]                                # (1, B)
        hh = jnp.dot(w_hh, h_prev, preferred_element_type=jnp.float32)  # MXU (H, B)
        # Input + bias term has no h-dependence -> hides under MXU/tanh latency.
        h_new = jnp.tanh(hh + w_ih_b * x_row + bias_b)               # EUP tanh
        # Output projection (Linear 32 -> 1): sum over H (sublane reduce).
        pred_ref[pl.ds(t, 1), :] = (
            jnp.sum(h_new * w_out_b, axis=0, keepdims=True) + b_out_b)
        return h_new

    if seq_len <= _FULL_UNROLL_MAX_SEQ:
        # Small static S: full unroll with static slices (max LLO overlap).
        h = h0_ref[...]
        for t in range(seq_len):
            h = step(t, h)
    else:
        # Long sequences: cap the unroll to bound instruction memory and
        # vreg live ranges; the recurrence is latency-bound anyway.
        h = lax.fori_loop(0, seq_len, step, h0_ref[...], unroll=8)

    hn_ref[...] = h


@jax.jit
def rnn_forward(x, h, params):
    """x: (S, B, 1) f32; h: (1, B, H) f32 -> (pred (S, B, 1), h_n (1, B, H))."""
    S, B, _ = x.shape
    H = HIDDEN

    # Layout prep (cheap XLA ops outside the kernel):
    #   squeeze x, transpose h to feature-major, pack the tiny parameter
    #   vectors into one (H, 4) array -> 1 DMA instead of 4 sub-tile transfers.
    x_sb = x[:, :, 0]                                # (S, B)
    h0_hb = jnp.transpose(h[0])                      # (H, B)
    w_hh = params["w_hh"]                            # (H, H), kernel does W_hh @ g
    packed = jnp.concatenate(
        [params["w_ih"].reshape(H, 1),
         (params["b_ih"] + params["b_hh"]).reshape(H, 1),
         params["w_out"].reshape(H, 1),
         jnp.full((H, 1), params["b_out"][0], jnp.float32)],
        axis=1)                                      # (H, 4)

    vmem = pl.BlockSpec(memory_space=pltpu.MemorySpace.VMEM)
    pred_sb, hn_hb = pl.pallas_call(
        rnn_kernel,
        out_shape=(
            jax.ShapeDtypeStruct((S, B), jnp.float32),
            jax.ShapeDtypeStruct((H, B), jnp.float32),
        ),
        in_specs=[vmem, vmem, vmem, vmem],
        out_specs=(vmem, vmem),
    )(x_sb, h0_hb, w_hh, packed)

    return pred_sb[..., None], jnp.transpose(hn_hb)[None]


def rnn_reference(x, h, params):
    """Pure-JAX reference matching PyTorch nn.RNN(tanh) + Linear semantics."""
    w_ih, w_hh = params["w_ih"], params["w_hh"]
    b_ih, b_hh = params["b_ih"], params["b_hh"]
    w_out, b_out = params["w_out"], params["b_out"]
    h0 = h[0]

    def step(h_prev, x_t):
        h_new = jnp.tanh(x_t @ w_ih.T + b_ih + h_prev @ w_hh.T + b_hh)
        return h_new, h_new

    h_n, outs = lax.scan(step, h0, x)
    pred = outs @ w_out.T + b_out
    return pred, h_n[None]


def init_params(key):
    """Deterministic init mimicking PyTorch uniform(-1/sqrt(H), 1/sqrt(H))."""
    k = 1.0 / jnp.sqrt(jnp.float32(HIDDEN))
    keys = jax.random.split(key, 6)
    return {
        "w_ih": jax.random.uniform(keys[0], (HIDDEN, INPUT_SIZE), jnp.float32, -k, k),
        "w_hh": jax.random.uniform(keys[1], (HIDDEN, HIDDEN), jnp.float32, -k, k),
        "b_ih": jax.random.uniform(keys[2], (HIDDEN,), jnp.float32, -k, k),
        "b_hh": jax.random.uniform(keys[3], (HIDDEN,), jnp.float32, -k, k),
        "w_out": jax.random.uniform(keys[4], (1, HIDDEN), jnp.float32, -k, k),
        "b_out": jax.random.uniform(keys[5], (1,), jnp.float32, -k, k),
    }


if __name__ == "__main__":
    key = jax.random.PRNGKey(0)
    pkey, xkey, hkey = jax.random.split(key, 3)

    SEQ, BATCH = 8, 2
    params = init_params(pkey)
    x = jax.random.normal(xkey, (SEQ, BATCH, INPUT_SIZE), jnp.float32)
    h0 = jax.random.normal(hkey, (1, BATCH, HIDDEN), jnp.float32)

    pred, h_n = rnn_forward(x, h0, params)
    pred, h_n = jax.block_until_ready((pred, h_n))

    ref_pred, ref_h = rnn_reference(x, h0, params)
    assert pred.shape == (SEQ, BATCH, 1) and h_n.shape == (1, BATCH, HIDDEN)
    assert jnp.allclose(pred, ref_pred, atol=2e-5, rtol=2e-5)
    assert jnp.allclose(h_n, ref_h, atol=2e-5, rtol=2e-5)

    print("KERNEL_OK")
</pallas_src>

<mosaic_0001>
module attributes {stable_mosaic.version = 11 : i64} {
  func.func @rnn_kernel(%arg0: memref<8x2xf32, #tpu.memory_space<vmem>>, %arg1: memref<32x2xf32, #tpu.memory_space<vmem>>, %arg2: memref<32x32xf32, #tpu.memory_space<vmem>>, %arg3: memref<32x4xf32, #tpu.memory_space<vmem>>, %arg4: memref<8x2xf32, #tpu.memory_space<vmem>>, %arg5: memref<32x2xf32, #tpu.memory_space<vmem>>) attributes {dimension_semantics = [], scalar_prefetch = 0 : i64, scratch_operands = 0 : i64, tpu.core_type = #tpu.core_type<tc>} {
    %c0 = arith.constant 0 : index
    %c0_0 = arith.constant 0 : index
    %0 = vector.load %arg2[%c0, %c0_0] : memref<32x32xf32, #tpu.memory_space<vmem>>, vector<32x32xf32>
    %c0_1 = arith.constant 0 : index
    %c0_2 = arith.constant 0 : index
    %1 = vector.load %arg3[%c0_1, %c0_2] : memref<32x4xf32, #tpu.memory_space<vmem>>, vector<32x1xf32>
    %2 = vector.shape_cast %1 : vector<32x1xf32> to vector<32x1xf32>
    %3 = vector.broadcast %2 : vector<32x1xf32> to vector<32x2xf32>
    %c0_3 = arith.constant 0 : index
    %c1 = arith.constant 1 : index
    %4 = vector.load %arg3[%c0_3, %c1] : memref<32x4xf32, #tpu.memory_space<vmem>>, vector<32x1xf32>
    %5 = vector.shape_cast %4 : vector<32x1xf32> to vector<32x1xf32>
    %6 = vector.broadcast %5 : vector<32x1xf32> to vector<32x2xf32>
    %c0_4 = arith.constant 0 : index
    %c2 = arith.constant 2 : index
    %7 = vector.load %arg3[%c0_4, %c2] : memref<32x4xf32, #tpu.memory_space<vmem>>, vector<32x1xf32>
    %8 = vector.shape_cast %7 : vector<32x1xf32> to vector<32x1xf32>
    %9 = vector.broadcast %8 : vector<32x1xf32> to vector<32x2xf32>
    %c0_5 = arith.constant 0 : index
    %c3 = arith.constant 3 : index
    %10 = vector.load %arg3[%c0_5, %c3] : memref<32x4xf32, #tpu.memory_space<vmem>>, vector<1x1xf32>
    %11 = vector.shape_cast %10 : vector<1x1xf32> to vector<1x1xf32>
    %12 = vector.broadcast %11 : vector<1x1xf32> to vector<1x2xf32>
    %c0_6 = arith.constant 0 : index
    %c0_7 = arith.constant 0 : index
    %13 = vector.load %arg1[%c0_6, %c0_7] : memref<32x2xf32, #tpu.memory_space<vmem>>, vector<32x2xf32>
    %c0_8 = arith.constant 0 : index
    %c0_9 = arith.constant 0 : index
    %14 = vector.load %arg0[%c0_8, %c0_9] : memref<8x2xf32, #tpu.memory_space<vmem>>, vector<1x2xf32>
    %cst = arith.constant dense<0.000000e+00> : vector<32x2xf32>
    %15 = tpu.matmul %0, %13, %cst {dimension_numbers = #tpu.dot_dimension_numbers<[1], [0], [0], [1], [0, 0, 1, 1], [], []>} : vector<32x32xf32>, vector<32x2xf32>, vector<32x2xf32> -> vector<32x2xf32>
    %16 = vector.broadcast %14 : vector<1x2xf32> to vector<32x2xf32>
    %17 = arith.mulf %3, %16 : vector<32x2xf32>
    %18 = arith.addf %15, %17 : vector<32x2xf32>
    %19 = arith.addf %18, %6 : vector<32x2xf32>
    %20 = math.tanh %19 : vector<32x2xf32>
    %21 = arith.mulf %20, %9 : vector<32x2xf32>
    %cst_10 = arith.constant dense<0.000000e+00> : vector<2xf32>
    %22 = vector.multi_reduction <add>, %21, %cst_10 [0] : vector<32x2xf32> to vector<2xf32>
    %23 = vector.shape_cast %22 : vector<2xf32> to vector<1x2xf32>
    %24 = arith.addf %23, %12 : vector<1x2xf32>
    %c0_11 = arith.constant 0 : index
    %c0_12 = arith.constant 0 : index
    %25 = vector.load %arg4[%c0_11, %c0_12] : memref<8x2xf32, #tpu.memory_space<vmem>>, vector<1x2xf32>
    tpu.vector_store %arg4[%c0_11, %c0_12], %24 {strides = array<i32>} : memref<8x2xf32, #tpu.memory_space<vmem>>, vector<1x2xf32>,
    %c1_13 = arith.constant 1 : index
    %c0_14 = arith.constant 0 : index
    %26 = vector.load %arg0[%c1_13, %c0_14] : memref<8x2xf32, #tpu.memory_space<vmem>>, vector<1x2xf32>
    %cst_15 = arith.constant dense<0.000000e+00> : vector<32x2xf32>
    %27 = tpu.matmul %0, %20, %cst_15 {dimension_numbers = #tpu.dot_dimension_numbers<[1], [0], [0], [1], [0, 0, 1, 1], [], []>} : vector<32x32xf32>, vector<32x2xf32>, vector<32x2xf32> -> vector<32x2xf32>
    %28 = vector.broadcast %26 : vector<1x2xf32> to vector<32x2xf32>
    %29 = arith.mulf %3, %28 : vector<32x2xf32>
    %30 = arith.addf %27, %29 : vector<32x2xf32>
    %31 = arith.addf %30, %6 : vector<32x2xf32>
    %32 = math.tanh %31 : vector<32x2xf32>
    %33 = arith.mulf %32, %9 : vector<32x2xf32>
    %cst_16 = arith.constant dense<0.000000e+00> : vector<2xf32>
    %34 = vector.multi_reduction <add>, %33, %cst_16 [0] : vector<32x2xf32> to vector<2xf32>
    %35 = vector.shape_cast %34 : vector<2xf32> to vector<1x2xf32>
    %36 = arith.addf %35, %12 : vector<1x2xf32>
    %c1_17 = arith.constant 1 : index
    %c0_18 = arith.constant 0 : index
    %37 = vector.load %arg4[%c1_17, %c0_18] : memref<8x2xf32, #tpu.memory_space<vmem>>, vector<1x2xf32>
    tpu.vector_store %arg4[%c1_17, %c0_18], %36 {strides = array<i32>} : memref<8x2xf32, #tpu.memory_space<vmem>>, vector<1x2xf32>,
    %c2_19 = arith.constant 2 : index
    %c0_20 = arith.constant 0 : index
    %38 = vector.load %arg0[%c2_19, %c0_20] : memref<8x2xf32, #tpu.memory_space<vmem>>, vector<1x2xf32>
    %cst_21 = arith.constant dense<0.000000e+00> : vector<32x2xf32>
    %39 = tpu.matmul %0, %32, %cst_21 {dimension_numbers = #tpu.dot_dimension_numbers<[1], [0], [0], [1], [0, 0, 1, 1], [], []>} : vector<32x32xf32>, vector<32x2xf32>, vector<32x2xf32> -> vector<32x2xf32>
    %40 = vector.broadcast %38 : vector<1x2xf32> to vector<32x2xf32>
    %41 = arith.mulf %3, %40 : vector<32x2xf32>
    %42 = arith.addf %39, %41 : vector<32x2xf32>
    %43 = arith.addf %42, %6 : vector<32x2xf32>
    %44 = math.tanh %43 : vector<32x2xf32>
    %45 = arith.mulf %44, %9 : vector<32x2xf32>
    %cst_22 = arith.constant dense<0.000000e+00> : vector<2xf32>
    %46 = vector.multi_reduction <add>, %45, %cst_22 [0] : vector<32x2xf32> to vector<2xf32>
    %47 = vector.shape_cast %46 : vector<2xf32> to vector<1x2xf32>
    %48 = arith.addf %47, %12 : vector<1x2xf32>
    %c2_23 = arith.constant 2 : index
    %c0_24 = arith.constant 0 : index
    %49 = vector.load %arg4[%c2_23, %c0_24] : memref<8x2xf32, #tpu.memory_space<vmem>>, vector<1x2xf32>
    tpu.vector_store %arg4[%c2_23, %c0_24], %48 {strides = array<i32>} : memref<8x2xf32, #tpu.memory_space<vmem>>, vector<1x2xf32>,
    %c3_25 = arith.constant 3 : index
    %c0_26 = arith.constant 0 : index
    %50 = vector.load %arg0[%c3_25, %c0_26] : memref<8x2xf32, #tpu.memory_space<vmem>>, vector<1x2xf32>
    %cst_27 = arith.constant dense<0.000000e+00> : vector<32x2xf32>
    %51 = tpu.matmul %0, %44, %cst_27 {dimension_numbers = #tpu.dot_dimension_numbers<[1], [0], [0], [1], [0, 0, 1, 1], [], []>} : vector<32x32xf32>, vector<32x2xf32>, vector<32x2xf32> -> vector<32x2xf32>
    %52 = vector.broadcast %50 : vector<1x2xf32> to vector<32x2xf32>
    %53 = arith.mulf %3, %52 : vector<32x2xf32>
    %54 = arith.addf %51, %53 : vector<32x2xf32>
    %55 = arith.addf %54, %6 : vector<32x2xf32>
    %56 = math.tanh %55 : vector<32x2xf32>
    %57 = arith.mulf %56, %9 : vector<32x2xf32>
    %cst_28 = arith.constant dense<0.000000e+00> : vector<2xf32>
    %58 = vector.multi_reduction <add>, %57, %cst_28 [0] : vector<32x2xf32> to vector<2xf32>
    %59 = vector.shape_cast %58 : vector<2xf32> to vector<1x2xf32>
    %60 = arith.addf %59, %12 : vector<1x2xf32>
    %c3_29 = arith.constant 3 : index
    %c0_30 = arith.constant 0 : index
    %61 = vector.load %arg4[%c3_29, %c0_30] : memref<8x2xf32, #tpu.memory_space<vmem>>, vector<1x2xf32>
    tpu.vector_store %arg4[%c3_29, %c0_30], %60 {strides = array<i32>} : memref<8x2xf32, #tpu.memory_space<vmem>>, vector<1x2xf32>,
    %c4 = arith.constant 4 : index
    %c0_31 = arith.constant 0 : index
    %62 = vector.load %arg0[%c4, %c0_31] : memref<8x2xf32, #tpu.memory_space<vmem>>, vector<1x2xf32>
    %cst_32 = arith.constant dense<0.000000e+00> : vector<32x2xf32>
    %63 = tpu.matmul %0, %56, %cst_32 {dimension_numbers = #tpu.dot_dimension_numbers<[1], [0], [0], [1], [0, 0, 1, 1], [], []>} : vector<32x32xf32>, vector<32x2xf32>, vector<32x2xf32> -> vector<32x2xf32>
    %64 = vector.broadcast %62 : vector<1x2xf32> to vector<32x2xf32>
    %65 = arith.mulf %3, %64 : vector<32x2xf32>
    %66 = arith.addf %63, %65 : vector<32x2xf32>
    %67 = arith.addf %66, %6 : vector<32x2xf32>
    %68 = math.tanh %67 : vector<32x2xf32>
    %69 = arith.mulf %68, %9 : vector<32x2xf32>
    %cst_33 = arith.constant dense<0.000000e+00> : vector<2xf32>
    %70 = vector.multi_reduction <add>, %69, %cst_33 [0] : vector<32x2xf32> to vector<2xf32>
    %71 = vector.shape_cast %70 : vector<2xf32> to vector<1x2xf32>
    %72 = arith.addf %71, %12 : vector<1x2xf32>
    %c4_34 = arith.constant 4 : index
    %c0_35 = arith.constant 0 : index
    %73 = vector.load %arg4[%c4_34, %c0_35] : memref<8x2xf32, #tpu.memory_space<vmem>>, vector<1x2xf32>
    tpu.vector_store %arg4[%c4_34, %c0_35], %72 {strides = array<i32>} : memref<8x2xf32, #tpu.memory_space<vmem>>, vector<1x2xf32>,
    %c5 = arith.constant 5 : index
    %c0_36 = arith.constant 0 : index
    %74 = vector.load %arg0[%c5, %c0_36] : memref<8x2xf32, #tpu.memory_space<vmem>>, vector<1x2xf32>
    %cst_37 = arith.constant dense<0.000000e+00> : vector<32x2xf32>
    %75 = tpu.matmul %0, %68, %cst_37 {dimension_numbers = #tpu.dot_dimension_numbers<[1], [0], [0], [1], [0, 0, 1, 1], [], []>} : vector<32x32xf32>, vector<32x2xf32>, vector<32x2xf32> -> vector<32x2xf32>
    %76 = vector.broadcast %74 : vector<1x2xf32> to vector<32x2xf32>
    %77 = arith.mulf %3, %76 : vector<32x2xf32>
    %78 = arith.addf %75, %77 : vector<32x2xf32>
    %79 = arith.addf %78, %6 : vector<32x2xf32>
    %80 = math.tanh %79 : vector<32x2xf32>
    %81 = arith.mulf %80, %9 : vector<32x2xf32>
    %cst_38 = arith.constant dense<0.000000e+00> : vector<2xf32>
    %82 = vector.multi_reduction <add>, %81, %cst_38 [0] : vector<32x2xf32> to vector<2xf32>
    %83 = vector.shape_cast %82 : vector<2xf32> to vector<1x2xf32>
    %84 = arith.addf %83, %12 : vector<1x2xf32>
    %c5_39 = arith.constant 5 : index
    %c0_40 = arith.constant 0 : index
    %85 = vector.load %arg4[%c5_39, %c0_40] : memref<8x2xf32, #tpu.memory_space<vmem>>, vector<1x2xf32>
    tpu.vector_store %arg4[%c5_39, %c0_40], %84 {strides = array<i32>} : memref<8x2xf32, #tpu.memory_space<vmem>>, vector<1x2xf32>,
    %c6 = arith.constant 6 : index
    %c0_41 = arith.constant 0 : index
    %86 = vector.load %arg0[%c6, %c0_41] : memref<8x2xf32, #tpu.memory_space<vmem>>, vector<1x2xf32>
    %cst_42 = arith.constant dense<0.000000e+00> : vector<32x2xf32>
    %87 = tpu.matmul %0, %80, %cst_42 {dimension_numbers = #tpu.dot_dimension_numbers<[1], [0], [0], [1], [0, 0, 1, 1], [], []>} : vector<32x32xf32>, vector<32x2xf32>, vector<32x2xf32> -> vector<32x2xf32>
    %88 = vector.broadcast %86 : vector<1x2xf32> to vector<32x2xf32>
    %89 = arith.mulf %3, %88 : vector<32x2xf32>
    %90 = arith.addf %87, %89 : vector<32x2xf32>
    %91 = arith.addf %90, %6 : vector<32x2xf32>
    %92 = math.tanh %91 : vector<32x2xf32>
    %93 = arith.mulf %92, %9 : vector<32x2xf32>
    %cst_43 = arith.constant dense<0.000000e+00> : vector<2xf32>
    %94 = vector.multi_reduction <add>, %93, %cst_43 [0] : vector<32x2xf32> to vector<2xf32>
    %95 = vector.shape_cast %94 : vector<2xf32> to vector<1x2xf32>
    %96 = arith.addf %95, %12 : vector<1x2xf32>
    %c6_44 = arith.constant 6 : index
    %c0_45 = arith.constant 0 : index
    %97 = vector.load %arg4[%c6_44, %c0_45] : memref<8x2xf32, #tpu.memory_space<vmem>>, vector<1x2xf32>
    tpu.vector_store %arg4[%c6_44, %c0_45], %96 {strides = array<i32>} : memref<8x2xf32, #tpu.memory_space<vmem>>, vector<1x2xf32>,
    %c7 = arith.constant 7 : index
    %c0_46 = arith.constant 0 : index
    %98 = vector.load %arg0[%c7, %c0_46] : memref<8x2xf32, #tpu.memory_space<vmem>>, vector<1x2xf32>
    %cst_47 = arith.constant dense<0.000000e+00> : vector<32x2xf32>
    %99 = tpu.matmul %0, %92, %cst_47 {dimension_numbers = #tpu.dot_dimension_numbers<[1], [0], [0], [1], [0, 0, 1, 1], [], []>} : vector<32x32xf32>, vector<32x2xf32>, vector<32x2xf32> -> vector<32x2xf32>
    %100 = vector.broadcast %98 : vector<1x2xf32> to vector<32x2xf32>
    %101 = arith.mulf %3, %100 : vector<32x2xf32>
    %102 = arith.addf %99, %101 : vector<32x2xf32>
    %103 = arith.addf %102, %6 : vector<32x2xf32>
    %104 = math.tanh %103 : vector<32x2xf32>
    %105 = arith.mulf %104, %9 : vector<32x2xf32>
    %cst_48 = arith.constant dense<0.000000e+00> : vector<2xf32>
    %106 = vector.multi_reduction <add>, %105, %cst_48 [0] : vector<32x2xf32> to vector<2xf32>
    %107 = vector.shape_cast %106 : vector<2xf32> to vector<1x2xf32>
    %108 = arith.addf %107, %12 : vector<1x2xf32>
    %c7_49 = arith.constant 7 : index
    %c0_50 = arith.constant 0 : index
    %109 = vector.load %arg4[%c7_49, %c0_50] : memref<8x2xf32, #tpu.memory_space<vmem>>, vector<1x2xf32>
    tpu.vector_store %arg4[%c7_49, %c0_50], %108 {strides = array<i32>} : memref<8x2xf32, #tpu.memory_space<vmem>>, vector<1x2xf32>,
    %c0_51 = arith.constant 0 : index
    %c0_52 = arith.constant 0 : index
    %110 = vector.load %arg5[%c0_51, %c0_52] : memref<32x2xf32, #tpu.memory_space<vmem>>, vector<32x2xf32>
    tpu.vector_store %arg5[%c0_51, %c0_52], %104 {strides = array<i32>} : memref<32x2xf32, #tpu.memory_space<vmem>>, vector<32x2xf32>,
    return
  }
}

</mosaic_0001>

<bundles_post_ra>
// kernel: rnn_forward.1
= control target key start
LH: loop header
LB: loop body
LE: loop exit
PB: predicated region body
PF: predicated region fallthrough
CT: control target
= control target key end

     0   :  { %vm98_vm0 = vcmask 261120   ;;  %v1439_v3 = vmov 0   ;;  %v1440_v14 = vmov 1   ;;  %v1441_v16 = vmov 2   ;;  %s1818_s1 = inlined_call_operand.vmem [shape: f32[32,2], index: 1, kind: input, shape index: {}]   ;;  %s1819_s2 = inlined_call_operand.vmem [shape: f32[32,32], index: 2, kind: input, shape index: {}]   ;;  %s1820_s3 = inlined_call_operand.vmem [shape: f32[32,4], index: 3, kind: input, shape index: {}]   ;;  %s1821_s0 = inlined_call_operand.vmem [shape: f32[8,2], index: 0, kind: input, shape index: {}]   ;;  %s1822_s4 = inlined_call_operand.vmem [shape: f32[8,2], index: 4, kind: output, shape index: {0}]   ;;  %s1823_s5 = inlined_call_operand.vmem [shape: f32[32,2], index: 5, kind: output, shape index: {1}]  }
   0x1   :  { %v85_v0 = vld [vmem:[%s1818_s1] sm:$0xff]  ;;  %v86_v1 = vld [vmem:[%s1818_s1 + $0x8] sm:$0xff]  ;;  %v87_v2 = vld [vmem:[%s1818_s1 + $0x10] sm:$0xff]  ;;  %1369 = vset.pattern.permute.xlu1 %v1439_v3  ;;  %1368 = vset.pattern.permute.xlu0 %v1439_v3  ;;  %v1442_v18 = vmov 3   ;;  %vm208_vm1 = vcmask 15360   ;;  %vm223_vm2 = vcmask 8192  }
   0x2   :  { %v1300_v4 = vpack.c.bf16 %v86_v1, %v85_v0  ;;  %v88_v5 = vld [vmem:[%s1818_s1 + $0x18] sm:$0xff]  ;;  %v1488_v6 = vld [vmem:[%s1819_s2] sm:$0xff]  ;;  %v25_v8 = vld [vmem:[%s1820_s3 + $0x10] sm:$0xff] }
   0x3   :  { %v1304_v7 = vpack.c.bf16 %v88_v5, %v87_v2  ;;  %1196 = vmatprep.mubr.msk.f32.mxu0 %vm98_vm0, %v1488_v6  ;;  %1210 = vmatprep.mubr.msk.f32.mxu1 %vm98_vm0, %v1488_v6  ;;  %v23_v9 = vld [vmem:[%s1820_s3] sm:$0xff]  ;;  %v26_v10 = vld [vmem:[%s1820_s3 + $0x18] sm:$0xff]  ;;  %v24_v11 = vld [vmem:[%s1820_s3 + $0x8] sm:$0xff] }
   0x4   :  { %1301 = vmatprep.subr.bf16.mxu0 %v1300_v4  ;;  %39 = vperm.xlu1 %1369, %v25_v8   ;;  %v1509_v12 = vld [vmem:[%s1819_s2 + $0x8] sm:$0xff]  ;;  %v1514_v13 = vld [vmem:[%s1819_s2 + $0x10] sm:$0xff]  ;;  %v1523_v15 = vld [vmem:[%s1819_s2 + $0x18] sm:$0xff] }
   0x5   :  { %1303 = vmatpush3.bf16.msra.mxu0 %v1300_v4  ;;  %29 = vperm.xlu0 %1368, %v23_v9   ;;  %v79_v17 = vld [vmem:[%s1820_s3] sm:$0x1] }
   0x6   :  { %1305 = vmatprep.subr.bf16.mxu0 %v1304_v7  ;;  %v1084_v24 = vld [vmem:[%s1821_s0] ss:$0 sm:$0xff] }
   0x8   :  { %44 = vperm.xlu1 %1369, %v26_v10  }
   0x9   :  { %1307 = vmatpush3.bf16.msra.mxu0 %v1304_v7  ;;  %34 = vperm.xlu0 %1368, %v24_v11  }
   0xc   :  { %1197 = vmatmul.mubr.msk.f32.vlgmr.msra.gmra.mrb[0].mxu0 %vm98_vm0, %v1509_v12  ;;  %1371 = vset.pattern.permute.xlu1 %v1440_v14 }
   0xd   :  { %1199 = vmatprep.mubr.msk.f32.mxu0 %vm98_vm0, %v1514_v13  ;;  %1370 = vset.pattern.permute.xlu0 %v1440_v14 }
   0xe   :  { %52 = vperm.xlu1 %1371, %v24_v11   ;;  %48 = vperm.xlu0 %1370, %v23_v9  }
  0x10   :  { %1200 = vmatmul.mubr.msk.f32.gmra.mrb[2].mxu0 %vm98_vm0, %v1523_v15 }
  0x11   :  { %1224 = vmatprep.mubr.msk.f32.mxu0 %vm98_vm0, %v1488_v6 }
  0x12   :  { %56 = vperm.xlu1 %1371, %v25_v8   ;;  %60 = vperm.xlu0 %1370, %v26_v10  }
  0x16   :  { %1372 = vset.pattern.permute.xlu1 %v1441_v16  ;;  %1373 = vset.pattern.permute.xlu0 %v1441_v16 }
  0x17   :  { %64 = vperm.xlu1 %1372, %v23_v9   ;;  %68 = vperm.xlu0 %1373, %v24_v11  }
  0x1b   :  { %72 = vperm.xlu1 %1372, %v25_v8   ;;  %1374 = vset.pattern.permute.xlu0 %v1442_v18 }
  0x1c   :  { %82 = vperm.xlu0 %1374, %v79_v17  }
  0x1f   :  { %76 = vperm.xlu1 %1372, %v26_v10   ;;  %v1089_v10 = vld [vmem:[%s1821_s0 + $0x1] ss:$0 sm:$0xff] }
  0x83   :  { %v1532_v19 = vpop.permute.xlu1 %39 }
  0x84   :  { %v1534_v20 = vpop.permute.xlu0 %29  ;;  %v96_v37 = vmul.f32 %v1084_v24, %v1532_v19 }
  0x85   :  { %v94_v28 = vmul.f32 %v1084_v24, %v1534_v20  ;;  %v230_v16 = vmul.f32 %v1089_v10, %v1534_v20 }
  0x87   :  { %v1536_v21 = vpop.permute.xlu1 %44 }
  0x88   :  { %v1538_v22 = vpop.permute.xlu0 %34  ;;  %v97_v34 = vmul.f32 %v1084_v24, %v1536_v21 }
  0x89   :  { %v95_v25 = vmul.f32 %v1084_v24, %v1538_v22  ;;  %v231_v11 = vmul.f32 %v1089_v10, %v1538_v22 }
  0x8d   :  { %v1540_v23 = vpop.permute.xlu1 %52  ;;  %v1546_v26 = vpop.permute.xlu0 %48 }
  0x91   :  { %v1549_v32 = vpop.permute.xlu1 %56  ;;  %v1555_v40 = vpop.permute.xlu0 %60 }
  0x96   :  { %v1557_v42 = vpop.permute.xlu1 %64  ;;  %v1563_v46 = vpop.permute.xlu0 %68 }
  0x9a   :  { %v1561_v45 = vpop.permute.xlu1 %72 }
  0x9b   :  { %v1583_v7 = vpop.permute.xlu0 %82 }
  0x9e   :  { %v1568_v53 = vpop.permute.xlu1 %76 }
  0xdf   :  { %v1198_v27 = vpop.f32.mrb[0].mxu0 }
  0xe0   :  { %v183_v29 = vadd.f32 %v1198_v27, %v95_v25  ;;  %v177_v30 = vpop.f32.mrb[1].mxu0  ;;  %v233_v27 = vmul.f32 %v1089_v10, %v1536_v21 }
  0xe1   :  { %v178_v31 = vadd.f32 %v177_v30, %v94_v28  ;;  %v232_v30 = vmul.f32 %v1089_v10, %v1532_v19 }
  0xe2   :  { %v197_v33 = vadd.f32 %v183_v29, %v1540_v23 }
  0xe3   :  { %v196_v35 = vadd.f32 %v178_v31, %v1546_v26  ;;  %v1201_v36 = vpop.f32.mrb[2].mxu0 }
  0xe4   :  { %1375 = vtanh.f32 %v197_v33  ;;  %v193_v38 = vadd.f32 %v1201_v36, %v97_v34  ;;  %v187_v39 = vpop.f32.mrb[3].mxu0 }
  0xe5   :  { %1377 = vtanh.f32 %v196_v35  ;;  %v188_v41 = vadd.f32 %v187_v39, %v96_v37 }
  0xe6   :  { %v199_v43 = vadd.f32 %v193_v38, %v1555_v40 }
  0xe7   :  { %v198_v44 = vadd.f32 %v188_v41, %v1549_v32 }
  0xe8   :  { %1379 = vtanh.f32 %v199_v43 }
  0xe9   :  { %1381 = vtanh.f32 %v198_v44 }
  0xee   :  { %v1376_v47 = vpop.eup %1375 }
  0xef   :  { %v1378_v48 = vpop.eup %1377  ;;  %v205_v49 = vmul.f32 %v1376_v47, %v1563_v46 }
  0xf0   :  { %v204_v50 = vmul.f32 %v1378_v48, %v1557_v42  ;;  %v1308_v51 = vpack.c.bf16 %v1376_v47, %v1378_v48 }
  0xf1   :  { %v210_v52 = vsel %vm208_vm1, %v205_v49, 0.0 }
  0xf2   :  { %v1380_v54 = vpop.eup %1379  ;;  %v209_v55 = vsel %vm208_vm1, %v204_v50, 0.0  ;;  %1309 = vmatprep.subr.bf16.mxu1 %v1308_v51 }
  0xf3   :  { %v1382_v56 = vpop.eup %1381  ;;  %v211_v57 = vadd.f32 %v210_v52, %v209_v55  ;;  %1311 = vmatpush3.bf16.msra.mxu1 %v1308_v51  ;;  %v207_v59 = vmul.f32 %v1380_v54, %v1568_v53 }
  0xf4   :  { %v206_v58 = vmul.f32 %v1382_v56, %v1561_v45  ;;  %v1312_v60 = vpack.c.bf16 %v1380_v54, %v1382_v56 }
  0xf5   :  { %v214_v63 = vsel %vm208_vm1, %v207_v59, 0.0 }
  0xf6   :  { %v212_v61 = vsel %vm208_vm1, %v206_v58, 0.0  ;;  %1313 = vmatprep.subr.bf16.mxu1 %v1312_v60 }
  0xf7   :  { %v213_v62 = vadd.f32 %v212_v61, %v211_v57  ;;  %1315 = vmatpush3.bf16.msra.mxu1 %v1312_v60 }
  0xf9   :  { %v215_v0 = vadd.f32 %v214_v63, %v213_v62 }
  0xfa   :  { %1211 = vmatmul.mubr.msk.f32.vlgmr.msra.gmra.mrb[0].mxu1 %vm98_vm0, %v1509_v12 }
  0xfb   :  { %v216_v1 = vrot.slane %v215_v0, 4  ;;  %1213 = vmatprep.mubr.msk.f32.mxu1 %vm98_vm0, %v1514_v13 }
  0xfd   :  { %v217_v2 = vadd.f32 %v216_v1, %v215_v0 }
  0xfe   :  { %1214 = vmatmul.mubr.msk.f32.gmra.mrb[2].mxu1 %vm98_vm0, %v1523_v15 }
  0xff   :  { %v218_v3 = vrot.slane %v217_v2, 2  ;;  %1238 = vmatprep.mubr.msk.f32.mxu1 %vm98_vm0, %v1488_v6 }
 0x101   :  { %v219_v4 = vadd.f32 %v218_v3, %v217_v2  ;;  %v1094_v2 = vld [vmem:[%s1821_s0 + $0x2] ss:$0 sm:$0xff] }
 0x102   :  { %v352_v3 = vmul.f32 %v1094_v2, %v1538_v22 }
 0x103   :  { %v220_v5 = vrot.slane %v219_v4, 1 }
 0x105   :  { %v221_v8 = vadd.f32 %v220_v5, %v219_v4  ;;  %v351_v5 = vmul.f32 %v1094_v2, %v1534_v20 }
 0x107   :  { %v222_v9 = vadd.f32 %v221_v8, %v1583_v7 }
 0x109   :  { %224 = vst.msk [vmem:[%s1822_s4] sm:$0x1] %vm223_vm2, %v222_v9 }
 0x1cd   :  { %v1212_v14 = vpop.f32.mrb[0].mxu1 }
 0x1ce   :  { %v306_v17 = vadd.f32 %v1212_v14, %v231_v11  ;;  %v300_v18 = vpop.f32.mrb[1].mxu1  ;;  %v354_v14 = vmul.f32 %v1094_v2, %v1536_v21 }
 0x1cf   :  { %v301_v24 = vadd.f32 %v300_v18, %v230_v16  ;;  %v353_v18 = vmul.f32 %v1094_v2, %v1532_v19 }
 0x1d0   :  { %v320_v25 = vadd.f32 %v306_v17, %v1540_v23 }
 0x1d1   :  { %v319_v28 = vadd.f32 %v301_v24, %v1546_v26  ;;  %v1215_v29 = vpop.f32.mrb[2].mxu1 }
 0x1d2   :  { %1383 = vtanh.f32 %v320_v25  ;;  %v316_v31 = vadd.f32 %v1215_v29, %v233_v27  ;;  %v310_v33 = vpop.f32.mrb[3].mxu1 }
 0x1d3   :  { %1385 = vtanh.f32 %v319_v28  ;;  %v311_v34 = vadd.f32 %v310_v33, %v232_v30 }
 0x1d4   :  { %v322_v35 = vadd.f32 %v316_v31, %v1555_v40 }
 0x1d5   :  { %v321_v36 = vadd.f32 %v311_v34, %v1549_v32 }
 0x1d6   :  { %1387 = vtanh.f32 %v322_v35 }
 0x1d7   :  { %1389 = vtanh.f32 %v321_v36 }
 0x1dc   :  { %v1384_v37 = vpop.eup %1383 }
 0x1dd   :  { %v1386_v38 = vpop.eup %1385  ;;  %v328_v39 = vmul.f32 %v1384_v37, %v1563_v46 }
 0x1de   :  { %v327_v41 = vmul.f32 %v1386_v38, %v1557_v42  ;;  %v1316_v43 = vpack.c.bf16 %v1384_v37, %v1386_v38 }
 0x1df   :  { %v332_v44 = vsel %vm208_vm1, %v328_v39, 0.0 }
 0x1e0   :  { %v1388_v47 = vpop.eup %1387  ;;  %v331_v48 = vsel %vm208_vm1, %v327_v41, 0.0  ;;  %1317 = vmatprep.subr.bf16.mxu0 %v1316_v43 }
 0x1e1   :  { %v1390_v49 = vpop.eup %1389  ;;  %v333_v50 = vadd.f32 %v332_v44, %v331_v48  ;;  %1319 = vmatpush3.bf16.msra.mxu0 %v1316_v43  ;;  %v330_v51 = vmul.f32 %v1388_v47, %v1568_v53 }
 0x1e2   :  { %v329_v52 = vmul.f32 %v1390_v49, %v1561_v45  ;;  %v1320_v54 = vpack.c.bf16 %v1388_v47, %v1390_v49 }
 0x1e3   :  { %v336_v57 = vsel %vm208_vm1, %v330_v51, 0.0 }
 0x1e4   :  { %v334_v55 = vsel %vm208_vm1, %v329_v52, 0.0  ;;  %1321 = vmatprep.subr.bf16.mxu0 %v1320_v54 }
 0x1e5   :  { %v335_v56 = vadd.f32 %v334_v55, %v333_v50  ;;  %1323 = vmatpush3.bf16.msra.mxu0 %v1320_v54 }
 0x1e7   :  { %v337_v58 = vadd.f32 %v336_v57, %v335_v56 }
 0x1e8   :  { %1225 = vmatmul.mubr.msk.f32.vlgmr.msra.gmra.mrb[4].mxu0 %vm98_vm0, %v1509_v12 }
 0x1e9   :  { %v338_v59 = vrot.slane %v337_v58, 4  ;;  %1227 = vmatprep.mubr.msk.f32.mxu0 %vm98_vm0, %v1514_v13 }
 0x1eb   :  { %v339_v60 = vadd.f32 %v338_v59, %v337_v58 }
 0x1ec   :  { %1228 = vmatmul.mubr.msk.f32.gmra.mrb[6].mxu0 %vm98_vm0, %v1523_v15 }
 0x1ed   :  { %v340_v61 = vrot.slane %v339_v60, 2  ;;  %1252 = vmatprep.mubr.msk.f32.mxu0 %vm98_vm0, %v1488_v6 }
 0x1ef   :  { %v341_v62 = vadd.f32 %v340_v61, %v339_v60  ;;  %v1099_v60 = vld [vmem:[%s1821_s0 + $0x3] ss:$0 sm:$0xff] }
 0x1f0   :  { %v473_v61 = vmul.f32 %v1099_v60, %v1538_v22 }
 0x1f1   :  { %v342_v63 = vrot.slane %v341_v62, 1 }
 0x1f3   :  { %v343_v0 = vadd.f32 %v342_v63, %v341_v62  ;;  %v472_v63 = vmul.f32 %v1099_v60, %v1534_v20 }
 0x1f5   :  { %v344_v1 = vadd.f32 %v343_v0, %v1583_v7 }
 0x1f7   :  { %345 = vst.msk [vmem:[%s1822_s4 + $0x1] sm:$0x1] %vm223_vm2, %v344_v1 }
 0x2bb   :  { %v1226_v4 = vpop.f32.mrb[4].mxu0 }
 0x2bc   :  { %v427_v8 = vadd.f32 %v1226_v4, %v352_v3  ;;  %v421_v9 = vpop.f32.mrb[5].mxu0  ;;  %v475_v4 = vmul.f32 %v1099_v60, %v1536_v21 }
 0x2bd   :  { %v422_v10 = vadd.f32 %v421_v9, %v351_v5  ;;  %v474_v9 = vmul.f32 %v1099_v60, %v1532_v19 }
 0x2be   :  { %v441_v11 = vadd.f32 %v427_v8, %v1540_v23 }
 0x2bf   :  { %v440_v16 = vadd.f32 %v422_v10, %v1546_v26  ;;  %v1229_v17 = vpop.f32.mrb[6].mxu0 }
 0x2c0   :  { %1391 = vtanh.f32 %v441_v11  ;;  %v437_v24 = vadd.f32 %v1229_v17, %v354_v14  ;;  %v431_v25 = vpop.f32.mrb[7].mxu0 }
 0x2c1   :  { %1393 = vtanh.f32 %v440_v16  ;;  %v432_v27 = vadd.f32 %v431_v25, %v353_v18 }
 0x2c2   :  { %v443_v28 = vadd.f32 %v437_v24, %v1555_v40 }
 0x2c3   :  { %v442_v29 = vadd.f32 %v432_v27, %v1549_v32 }
 0x2c4   :  { %1395 = vtanh.f32 %v443_v28 }
 0x2c5   :  { %1397 = vtanh.f32 %v442_v29 }
 0x2ca   :  { %v1392_v30 = vpop.eup %1391 }
 0x2cb   :  { %v1394_v31 = vpop.eup %1393  ;;  %v449_v33 = vmul.f32 %v1392_v30, %v1563_v46 }
 0x2cc   :  { %v448_v34 = vmul.f32 %v1394_v31, %v1557_v42  ;;  %v1324_v35 = vpack.c.bf16 %v1392_v30, %v1394_v31 }
 0x2cd   :  { %v453_v36 = vsel %vm208_vm1, %v449_v33, 0.0 }
 0x2ce   :  { %v1396_v37 = vpop.eup %1395  ;;  %v452_v38 = vsel %vm208_vm1, %v448_v34, 0.0  ;;  %1325 = vmatprep.subr.bf16.mxu1 %v1324_v35 }
 0x2cf   :  { %v1398_v39 = vpop.eup %1397  ;;  %v454_v41 = vadd.f32 %v453_v36, %v452_v38  ;;  %1327 = vmatpush3.bf16.msra.mxu1 %v1324_v35  ;;  %v451_v43 = vmul.f32 %v1396_v37, %v1568_v53 }
 0x2d0   :  { %v450_v44 = vmul.f32 %v1398_v39, %v1561_v45  ;;  %v1328_v47 = vpack.c.bf16 %v1396_v37, %v1398_v39 }
 0x2d1   :  { %v457_v50 = vsel %vm208_vm1, %v451_v43, 0.0 }
 0x2d2   :  { %v455_v48 = vsel %vm208_vm1, %v450_v44, 0.0  ;;  %1329 = vmatprep.subr.bf16.mxu1 %v1328_v47 }
 0x2d3   :  { %v456_v49 = vadd.f32 %v455_v48, %v454_v41  ;;  %1331 = vmatpush3.bf16.msra.mxu1 %v1328_v47 }
 0x2d5   :  { %v458_v51 = vadd.f32 %v457_v50, %v456_v49 }
 0x2d6   :  { %1239 = vmatmul.mubr.msk.f32.vlgmr.msra.gmra.mrb[4].mxu1 %vm98_vm0, %v1509_v12 }
 0x2d7   :  { %v459_v52 = vrot.slane %v458_v51, 4  ;;  %1241 = vmatprep.mubr.msk.f32.mxu1 %vm98_vm0, %v1514_v13 }
 0x2d9   :  { %v460_v54 = vadd.f32 %v459_v52, %v458_v51 }
 0x2da   :  { %1242 = vmatmul.mubr.msk.f32.gmra.mrb[6].mxu1 %vm98_vm0, %v1523_v15 }
 0x2db   :  { %v461_v55 = vrot.slane %v460_v54, 2  ;;  %1266 = vmatprep.mubr.msk.f32.mxu1 %vm98_vm0, %v1488_v6 }
 0x2dd   :  { %v462_v56 = vadd.f32 %v461_v55, %v460_v54  ;;  %v1104_v54 = vld [vmem:[%s1821_s0 + $0x4] ss:$0 sm:$0xff] }
 0x2de   :  { %v594_v55 = vmul.f32 %v1104_v54, %v1538_v22 }
 0x2df   :  { %v463_v57 = vrot.slane %v462_v56, 1 }
 0x2e1   :  { %v464_v58 = vadd.f32 %v463_v57, %v462_v56  ;;  %v593_v57 = vmul.f32 %v1104_v54, %v1534_v20 }
 0x2e3   :  { %v465_v59 = vadd.f32 %v464_v58, %v1583_v7 }
 0x2e5   :  { %466 = vst.msk [vmem:[%s1822_s4 + $0x2] sm:$0x1] %vm223_vm2, %v465_v59 }
 0x3a9   :  { %v1240_v62 = vpop.f32.mrb[4].mxu1 }
 0x3aa   :  { %v548_v0 = vadd.f32 %v1240_v62, %v473_v61  ;;  %v542_v1 = vpop.f32.mrb[5].mxu1  ;;  %v596_v62 = vmul.f32 %v1104_v54, %v1536_v21 }
 0x3ab   :  { %v543_v2 = vadd.f32 %v542_v1, %v472_v63  ;;  %v595_v1 = vmul.f32 %v1104_v54, %v1532_v19 }
 0x3ac   :  { %v562_v3 = vadd.f32 %v548_v0, %v1540_v23 }
 0x3ad   :  { %v561_v5 = vadd.f32 %v543_v2, %v1546_v26  ;;  %v1243_v8 = vpop.f32.mrb[6].mxu1 }
 0x3ae   :  { %1399 = vtanh.f32 %v562_v3  ;;  %v558_v10 = vadd.f32 %v1243_v8, %v475_v4  ;;  %v552_v11 = vpop.f32.mrb[7].mxu1 }
 0x3af   :  { %1401 = vtanh.f32 %v561_v5  ;;  %v553_v14 = vadd.f32 %v552_v11, %v474_v9 }
 0x3b0   :  { %v564_v16 = vadd.f32 %v558_v10, %v1555_v40 }
 0x3b1   :  { %v563_v17 = vadd.f32 %v553_v14, %v1549_v32 }
 0x3b2   :  { %1403 = vtanh.f32 %v564_v16 }
 0x3b3   :  { %1405 = vtanh.f32 %v563_v17 }
 0x3b8   :  { %v1400_v18 = vpop.eup %1399 }
 0x3b9   :  { %v1402_v24 = vpop.eup %1401  ;;  %v570_v25 = vmul.f32 %v1400_v18, %v1563_v46 }
 0x3ba   :  { %v569_v27 = vmul.f32 %v1402_v24, %v1557_v42  ;;  %v1332_v28 = vpack.c.bf16 %v1400_v18, %v1402_v24 }
 0x3bb   :  { %v574_v29 = vsel %vm208_vm1, %v570_v25, 0.0 }
 0x3bc   :  { %v1404_v30 = vpop.eup %1403  ;;  %v573_v31 = vsel %vm208_vm1, %v569_v27, 0.0  ;;  %1333 = vmatprep.subr.bf16.mxu0 %v1332_v28 }
 0x3bd   :  { %v1406_v33 = vpop.eup %1405  ;;  %v575_v34 = vadd.f32 %v574_v29, %v573_v31  ;;  %1335 = vmatpush3.bf16.msra.mxu0 %v1332_v28  ;;  %v572_v35 = vmul.f32 %v1404_v30, %v1568_v53 }
 0x3be   :  { %v571_v36 = vmul.f32 %v1406_v33, %v1561_v45  ;;  %v1336_v37 = vpack.c.bf16 %v1404_v30, %v1406_v33 }
 0x3bf   :  { %v578_v41 = vsel %vm208_vm1, %v572_v35, 0.0 }
 0x3c0   :  { %v576_v38 = vsel %vm208_vm1, %v571_v36, 0.0  ;;  %1337 = vmatprep.subr.bf16.mxu0 %v1336_v37 }
 0x3c1   :  { %v577_v39 = vadd.f32 %v576_v38, %v575_v34  ;;  %1339 = vmatpush3.bf16.msra.mxu0 %v1336_v37 }
 0x3c3   :  { %v579_v43 = vadd.f32 %v578_v41, %v577_v39 }
 0x3c4   :  { %1253 = vmatmul.mubr.msk.f32.vlgmr.msra.gmra.mrb[8].mxu0 %vm98_vm0, %v1509_v12 }
 0x3c5   :  { %v580_v44 = vrot.slane %v579_v43, 4  ;;  %1255 = vmatprep.mubr.msk.f32.mxu0 %vm98_vm0, %v1514_v13 }
 0x3c7   :  { %v581_v47 = vadd.f32 %v580_v44, %v579_v43 }
 0x3c8   :  { %1256 = vmatmul.mubr.msk.f32.gmra.mrb[10].mxu0 %vm98_vm0, %v1523_v15 }
 0x3c9   :  { %v582_v48 = vrot.slane %v581_v47, 2  ;;  %1280 = vmatprep.mubr.msk.f32.mxu0 %vm98_vm0, %v1488_v6 }
 0x3cb   :  { %v583_v49 = vadd.f32 %v582_v48, %v581_v47  ;;  %v1109_v47 = vld [vmem:[%s1821_s0 + $0x5] ss:$0 sm:$0xff] }
 0x3cc   :  { %v715_v48 = vmul.f32 %v1109_v47, %v1538_v22 }
 0x3cd   :  { %v584_v50 = vrot.slane %v583_v49, 1 }
 0x3cf   :  { %v585_v51 = vadd.f32 %v584_v50, %v583_v49  ;;  %v714_v50 = vmul.f32 %v1109_v47, %v1534_v20 }
 0x3d1   :  { %v586_v52 = vadd.f32 %v585_v51, %v1583_v7 }
 0x3d3   :  { %587 = vst.msk [vmem:[%s1822_s4 + $0x3] sm:$0x1] %vm223_vm2, %v586_v52 }
 0x497   :  { %v1254_v56 = vpop.f32.mrb[8].mxu0 }
 0x498   :  { %v669_v58 = vadd.f32 %v1254_v56, %v594_v55  ;;  %v663_v59 = vpop.f32.mrb[9].mxu0  ;;  %v717_v55 = vmul.f32 %v1109_v47, %v1536_v21 }
 0x499   :  { %v664_v60 = vadd.f32 %v663_v59, %v593_v57 }
 0x49a   :  { %v683_v61 = vadd.f32 %v669_v58, %v1540_v23  ;;  %v716_v58 = vmul.f32 %v1109_v47, %v1532_v19 }
 0x49b   :  { %v682_v63 = vadd.f32 %v664_v60, %v1546_v26  ;;  %v1257_v0 = vpop.f32.mrb[10].mxu0 }
 0x49c   :  { %1407 = vtanh.f32 %v683_v61  ;;  %v679_v2 = vadd.f32 %v1257_v0, %v596_v62  ;;  %v673_v3 = vpop.f32.mrb[11].mxu0 }
 0x49d   :  { %1409 = vtanh.f32 %v682_v63  ;;  %v674_v4 = vadd.f32 %v673_v3, %v595_v1 }
 0x49e   :  { %v685_v5 = vadd.f32 %v679_v2, %v1555_v40 }
 0x49f   :  { %v684_v8 = vadd.f32 %v674_v4, %v1549_v32 }
 0x4a0   :  { %1411 = vtanh.f32 %v685_v5 }
 0x4a1   :  { %1413 = vtanh.f32 %v684_v8 }
 0x4a6   :  { %v1408_v9 = vpop.eup %1407 }
 0x4a7   :  { %v1410_v10 = vpop.eup %1409  ;;  %v691_v11 = vmul.f32 %v1408_v9, %v1563_v46 }
 0x4a8   :  { %v690_v14 = vmul.f32 %v1410_v10, %v1557_v42  ;;  %v1340_v16 = vpack.c.bf16 %v1408_v9, %v1410_v10 }
 0x4a9   :  { %v695_v17 = vsel %vm208_vm1, %v691_v11, 0.0 }
 0x4aa   :  { %v1412_v18 = vpop.eup %1411  ;;  %v694_v24 = vsel %vm208_vm1, %v690_v14, 0.0  ;;  %1341 = vmatprep.subr.bf16.mxu1 %v1340_v16 }
 0x4ab   :  { %v1414_v25 = vpop.eup %1413  ;;  %v696_v27 = vadd.f32 %v695_v17, %v694_v24  ;;  %1343 = vmatpush3.bf16.msra.mxu1 %v1340_v16  ;;  %v693_v28 = vmul.f32 %v1412_v18, %v1568_v53 }
 0x4ac   :  { %v692_v29 = vmul.f32 %v1414_v25, %v1561_v45  ;;  %v1344_v30 = vpack.c.bf16 %v1412_v18, %v1414_v25 }
 0x4ad   :  { %v699_v34 = vsel %vm208_vm1, %v693_v28, 0.0 }
 0x4ae   :  { %v697_v31 = vsel %vm208_vm1, %v692_v29, 0.0  ;;  %1345 = vmatprep.subr.bf16.mxu1 %v1344_v30 }
 0x4af   :  { %v698_v33 = vadd.f32 %v697_v31, %v696_v27  ;;  %1347 = vmatpush3.bf16.msra.mxu1 %v1344_v30 }
 0x4b1   :  { %v700_v35 = vadd.f32 %v699_v34, %v698_v33 }
 0x4b2   :  { %1267 = vmatmul.mubr.msk.f32.vlgmr.msra.gmra.mrb[8].mxu1 %vm98_vm0, %v1509_v12 }
 0x4b3   :  { %v701_v36 = vrot.slane %v700_v35, 4  ;;  %1269 = vmatprep.mubr.msk.f32.mxu1 %vm98_vm0, %v1514_v13 }
 0x4b5   :  { %v702_v37 = vadd.f32 %v701_v36, %v700_v35  ;;  %v1114_v36 = vld [vmem:[%s1821_s0 + $0x6] ss:$0 sm:$0xff] }
 0x4b6   :  { %1270 = vmatmul.mubr.msk.f32.gmra.mrb[10].mxu1 %vm98_vm0, %v1523_v15 }
 0x4b7   :  { %v703_v38 = vrot.slane %v702_v37, 2  ;;  %1294 = vmatprep.mubr.msk.f32.mxu1 %vm98_vm0, %v1488_v6 }
 0x4b9   :  { %v704_v39 = vadd.f32 %v703_v38, %v702_v37  ;;  %v836_v37 = vmul.f32 %v1114_v36, %v1538_v22 }
 0x4bb   :  { %v705_v41 = vrot.slane %v704_v39, 1 }
 0x4bd   :  { %v706_v43 = vadd.f32 %v705_v41, %v704_v39  ;;  %v835_v39 = vmul.f32 %v1114_v36, %v1534_v20 }
 0x4bf   :  { %v707_v44 = vadd.f32 %v706_v43, %v1583_v7 }
 0x4c1   :  { %708 = vst.msk [vmem:[%s1822_s4 + $0x4] sm:$0x1] %vm223_vm2, %v707_v44 }
 0x585   :  { %v1268_v49 = vpop.f32.mrb[8].mxu1 }
 0x586   :  { %v790_v6 = vadd.f32 %v1268_v49, %v715_v48  ;;  %v784_v51 = vpop.f32.mrb[9].mxu1  ;;  %v838_v48 = vmul.f32 %v1114_v36, %v1536_v21 }
 0x587   :  { %v785_v52 = vadd.f32 %v784_v51, %v714_v50 }
 0x588   :  { %v804_v54 = vadd.f32 %v790_v6, %v1540_v23  ;;  %v837_v6 = vmul.f32 %v1114_v36, %v1532_v19 }
 0x589   :  { %v803_v56 = vadd.f32 %v785_v52, %v1546_v26  ;;  %v1271_v57 = vpop.f32.mrb[10].mxu1 }
 0x58a   :  { %1415 = vtanh.f32 %v804_v54  ;;  %v800_v59 = vadd.f32 %v1271_v57, %v717_v55  ;;  %v794_v60 = vpop.f32.mrb[11].mxu1 }
 0x58b   :  { %1417 = vtanh.f32 %v803_v56  ;;  %v795_v61 = vadd.f32 %v794_v60, %v716_v58 }
 0x58c   :  { %v806_v62 = vadd.f32 %v800_v59, %v1555_v40 }
 0x58d   :  { %v805_v63 = vadd.f32 %v795_v61, %v1549_v32 }
 0x58e   :  { %1419 = vtanh.f32 %v806_v62 }
 0x58f   :  { %1421 = vtanh.f32 %v805_v63 }
 0x594   :  { %v1416_v0 = vpop.eup %1415 }
 0x595   :  { %v1418_v1 = vpop.eup %1417  ;;  %v812_v2 = vmul.f32 %v1416_v0, %v1563_v46 }
 0x596   :  { %v811_v3 = vmul.f32 %v1418_v1, %v1557_v42  ;;  %v1348_v4 = vpack.c.bf16 %v1416_v0, %v1418_v1 }
 0x597   :  { %v816_v5 = vsel %vm208_vm1, %v812_v2, 0.0 }
 0x598   :  { %v1420_v8 = vpop.eup %1419  ;;  %v815_v9 = vsel %vm208_vm1, %v811_v3, 0.0  ;;  %1349 = vmatprep.subr.bf16.mxu0 %v1348_v4 }
 0x599   :  { %v1422_v10 = vpop.eup %1421  ;;  %v817_v11 = vadd.f32 %v816_v5, %v815_v9  ;;  %1351 = vmatpush3.bf16.msra.mxu0 %v1348_v4  ;;  %v814_v14 = vmul.f32 %v1420_v8, %v1568_v53 }
 0x59a   :  { %v813_v16 = vmul.f32 %v1422_v10, %v1561_v45  ;;  %v1352_v17 = vpack.c.bf16 %v1420_v8, %v1422_v10 }
 0x59b   :  { %v820_v25 = vsel %vm208_vm1, %v814_v14, 0.0 }
 0x59c   :  { %v818_v18 = vsel %vm208_vm1, %v813_v16, 0.0  ;;  %1353 = vmatprep.subr.bf16.mxu0 %v1352_v17 }
 0x59d   :  { %v819_v24 = vadd.f32 %v818_v18, %v817_v11  ;;  %1355 = vmatpush3.bf16.msra.mxu0 %v1352_v17 }
 0x59f   :  { %v821_v27 = vadd.f32 %v820_v25, %v819_v24 }
 0x5a0   :  { %1281 = vmatmul.mubr.msk.f32.vlgmr.msra.gmra.mrb[12].mxu0 %vm98_vm0, %v1509_v12 }
 0x5a1   :  { %v822_v28 = vrot.slane %v821_v27, 4  ;;  %1283 = vmatprep.mubr.msk.f32.mxu0 %vm98_vm0, %v1514_v13 }
 0x5a3   :  { %v823_v29 = vadd.f32 %v822_v28, %v821_v27 }
 0x5a4   :  { %1284 = vmatmul.mubr.msk.f32.gmra.mrb[14].mxu0 %vm98_vm0, %v1523_v15 }
 0x5a5   :  { %v824_v30 = vrot.slane %v823_v29, 2 }
 0x5a7   :  { %v825_v31 = vadd.f32 %v824_v30, %v823_v29 }
 0x5a9   :  { %v826_v33 = vrot.slane %v825_v31, 1 }
 0x5ab   :  { %v827_v34 = vadd.f32 %v826_v33, %v825_v31 }
 0x5ad   :  { %v828_v35 = vadd.f32 %v827_v34, %v1583_v7 }
 0x5af   :  { %829 = vst.msk [vmem:[%s1822_s4 + $0x5] sm:$0x1] %vm223_vm2, %v828_v35 }
 0x673   :  { %v1282_v38 = vpop.f32.mrb[12].mxu0 }
 0x674   :  { %v911_v41 = vadd.f32 %v1282_v38, %v836_v37  ;;  %v905_v43 = vpop.f32.mrb[13].mxu0 }
 0x675   :  { %v906_v44 = vadd.f32 %v905_v43, %v835_v39 }
 0x676   :  { %v925_v47 = vadd.f32 %v911_v41, %v1540_v23 }
 0x677   :  { %v924_v49 = vadd.f32 %v906_v44, %v1546_v26  ;;  %v1285_v50 = vpop.f32.mrb[14].mxu0 }
 0x678   :  { %1423 = vtanh.f32 %v925_v47  ;;  %v921_v51 = vadd.f32 %v1285_v50, %v838_v48  ;;  %v915_v52 = vpop.f32.mrb[15].mxu0 }
 0x679   :  { %1425 = vtanh.f32 %v924_v49  ;;  %v916_v54 = vadd.f32 %v915_v52, %v837_v6 }
 0x67a   :  { %v927_v55 = vadd.f32 %v921_v51, %v1555_v40 }
 0x67b   :  { %v926_v56 = vadd.f32 %v916_v54, %v1549_v32 }
 0x67c   :  { %1427 = vtanh.f32 %v927_v55 }
 0x67d   :  { %1429 = vtanh.f32 %v926_v56 }
 0x682   :  { %v1424_v57 = vpop.eup %1423 }
 0x683   :  { %v1426_v58 = vpop.eup %1425  ;;  %v933_v59 = vmul.f32 %v1424_v57, %v1563_v46 }
 0x684   :  { %v932_v60 = vmul.f32 %v1426_v58, %v1557_v42  ;;  %v1356_v61 = vpack.c.bf16 %v1424_v57, %v1426_v58 }
 0x685   :  { %v937_v62 = vsel %vm208_vm1, %v933_v59, 0.0 }
 0x686   :  { %v1428_v63 = vpop.eup %1427  ;;  %v936_v0 = vsel %vm208_vm1, %v932_v60, 0.0  ;;  %1357 = vmatprep.subr.bf16.mxu1 %v1356_v61 }
 0x687   :  { %v1430_v1 = vpop.eup %1429  ;;  %v938_v2 = vadd.f32 %v937_v62, %v936_v0  ;;  %1359 = vmatpush3.bf16.msra.mxu1 %v1356_v61  ;;  %v935_v3 = vmul.f32 %v1428_v63, %v1568_v53 }
 0x688   :  { %v934_v4 = vmul.f32 %v1430_v1, %v1561_v45  ;;  %v1360_v5 = vpack.c.bf16 %v1428_v63, %v1430_v1 }
 0x689   :  { %v941_v10 = vsel %vm208_vm1, %v935_v3, 0.0 }
 0x68a   :  { %v939_v8 = vsel %vm208_vm1, %v934_v4, 0.0  ;;  %1361 = vmatprep.subr.bf16.mxu1 %v1360_v5 }
 0x68b   :  { %v940_v9 = vadd.f32 %v939_v8, %v938_v2  ;;  %1363 = vmatpush3.bf16.msra.mxu1 %v1360_v5 }
 0x68d   :  { %v942_v11 = vadd.f32 %v941_v10, %v940_v9 }
 0x68e   :  { %1295 = vmatmul.mubr.msk.f32.vlgmr.msra.gmra.mrb[12].mxu1 %vm98_vm0, %v1509_v12  ;;  %v1119_v12 = vld [vmem:[%s1821_s0 + $0x7] ss:$0 sm:$0xff] }
 0x68f   :  { %v943_v14 = vrot.slane %v942_v11, 4  ;;  %1297 = vmatprep.mubr.msk.f32.mxu1 %vm98_vm0, %v1514_v13  ;;  %v957_v13 = vmul.f32 %v1119_v12, %v1538_v22  ;;  %v959_v34 = vmul.f32 %v1119_v12, %v1536_v21  ;;  %v958_v37 = vmul.f32 %v1119_v12, %v1532_v19 }
 0x691   :  { %v944_v16 = vadd.f32 %v943_v14, %v942_v11 }
 0x692   :  { %1298 = vmatmul.mubr.msk.f32.gmra.mrb[14].mxu1 %vm98_vm0, %v1523_v15  ;;  %v956_v15 = vmul.f32 %v1119_v12, %v1534_v20 }
 0x693   :  { %v945_v17 = vrot.slane %v944_v16, 2 }
 0x695   :  { %v946_v18 = vadd.f32 %v945_v17, %v944_v16 }
 0x697   :  { %v947_v24 = vrot.slane %v946_v18, 1 }
 0x699   :  { %v948_v25 = vadd.f32 %v947_v24, %v946_v18 }
 0x69b   :  { %v949_v27 = vadd.f32 %v948_v25, %v1583_v7 }
 0x69d   :  { %950 = vst.msk [vmem:[%s1822_s4 + $0x6] sm:$0x1] %vm223_vm2, %v949_v27 }
 0x761   :  { %v1296_v28 = vpop.f32.mrb[12].mxu1 }
 0x762   :  { %v1032_v29 = vadd.f32 %v1296_v28, %v957_v13  ;;  %v1026_v30 = vpop.f32.mrb[13].mxu1 }
 0x763   :  { %v1027_v31 = vadd.f32 %v1026_v30, %v956_v15 }
 0x764   :  { %v1046_v33 = vadd.f32 %v1032_v29, %v1540_v23 }
 0x765   :  { %v1045_v35 = vadd.f32 %v1027_v31, %v1546_v26  ;;  %v1299_v36 = vpop.f32.mrb[14].mxu1 }
 0x766   :  { %1431 = vtanh.f32 %v1046_v33  ;;  %v1042_v38 = vadd.f32 %v1299_v36, %v959_v34  ;;  %v1036_v39 = vpop.f32.mrb[15].mxu1 }
 0x767   :  { %1433 = vtanh.f32 %v1045_v35  ;;  %v1037_v22 = vadd.f32 %v1036_v39, %v958_v37 }
 0x768   :  { %v1048_v41 = vadd.f32 %v1042_v38, %v1555_v40 }
 0x769   :  { %v1047_v20 = vadd.f32 %v1037_v22, %v1549_v32 }
 0x76a   :  { %1435 = vtanh.f32 %v1048_v41 }
 0x76b   :  { %1437 = vtanh.f32 %v1047_v20 }
 0x770   :  { %v1432_v43 = vpop.eup %1431 }
 0x771   :  { %v1434_v23 = vpop.eup %1433  ;;  %v1054_v21 = vmul.f32 %v1432_v43, %v1563_v46  ;;  %1073 = vst.msk [vmem:[%s1823_s5 + $0x8] sm:$0xff] %vm208_vm1, %v1432_v43 }
 0x772   :  { %v1053_v19 = vmul.f32 %v1434_v23, %v1557_v42  ;;  %1072 = vst.msk [vmem:[%s1823_s5] sm:$0xff] %vm208_vm1, %v1434_v23 }
 0x773   :  { %v1058_v26 = vsel %vm208_vm1, %v1054_v21, 0.0 }
 0x774   :  { %v1436_v32 = vpop.eup %1435  ;;  %v1057_v40 = vsel %vm208_vm1, %v1053_v19, 0.0 }
 0x775   :  { %v1438_v44 = vpop.eup %1437  ;;  %v1059_v47 = vadd.f32 %v1058_v26, %v1057_v40  ;;  %1075 = vst.msk [vmem:[%s1823_s5 + $0x18] sm:$0xff] %vm208_vm1, %v1436_v32  ;;  %v1056_v46 = vmul.f32 %v1436_v32, %v1568_v53 }
 0x776   :  { %v1055_v42 = vmul.f32 %v1438_v44, %v1561_v45  ;;  %1074 = vst.msk [vmem:[%s1823_s5 + $0x10] sm:$0xff] %vm208_vm1, %v1438_v44 }
 0x777   :  { %v1062_v50 = vsel %vm208_vm1, %v1056_v46, 0.0 }
 0x778   :  { %v1060_v48 = vsel %vm208_vm1, %v1055_v42, 0.0 }
 0x779   :  { %v1061_v49 = vadd.f32 %v1060_v48, %v1059_v47 }
 0x77b   :  { %v1063_v6 = vadd.f32 %v1062_v50, %v1061_v49 }
 0x77d   :  { %v1064_v51 = vrot.slane %v1063_v6, 4 }
 0x77f   :  { %v1065_v52 = vadd.f32 %v1064_v51, %v1063_v6 }
 0x781   :  { %v1066_v54 = vrot.slane %v1065_v52, 2 }
 0x783   :  { %v1067_v55 = vadd.f32 %v1066_v54, %v1065_v52 }
 0x785   :  { %v1068_v56 = vrot.slane %v1067_v55, 1 }
 0x787   :  { %v1069_v57 = vadd.f32 %v1068_v56, %v1067_v55 }
 0x789   :  { %v1070_v53 = vadd.f32 %v1069_v57, %v1583_v7 }
 0x78b   :  { %1071 = vst.msk [vmem:[%s1822_s4 + $0x7] sm:$0x1] %vm223_vm2, %v1070_v53 }

</bundles_post_ra>
